<compile_context>
chip_gen: v7x
topology: tpu7x:2x2x1
jax: 0.10.0
libtpu: 0.0.40
codegen_flags: <defaults>
</compile_context>

<pallas_src>
import functools

import jax
import jax.numpy as jnp
from jax import lax
from jax.experimental import pallas as pl
from jax.experimental.pallas import tpu as pltpu


# y = x @ W.T without materializing the transpose: contract the in-features
# axis (dim 1) of the PyTorch-layout [out, in] weight.
_DN_WT = (((1,), (1,)), ((), ()))


def _proj_kernel(x_ref, w_ref, o_ref, *, n_head, d_head, scale):
    """Per (batch, seq-tile): y = x @ W.T (optionally scaled), emitted head-major."""
    ts = x_ref.shape[1]
    y = lax.dot_general(x_ref[0], w_ref[...], _DN_WT,
                        preferred_element_type=jnp.float32)       # (ts, D) f32
    if scale != 1.0:
        y = y * scale
    # One head-split relayout per *token* (hoisted out of the flash kv loop).
    yh = jnp.transpose(y.reshape(ts, n_head, d_head), (1, 0, 2))  # (h, ts, dh)
    o_ref[0] = yh.astype(o_ref.dtype)


def _flash_kernel(q_ref, k_ref, v_ref, o_ref, m_sc, l_sc, acc_sc):
    """One (batch*head, q-tile) block; online softmax over the kv-tile axis."""
    ki = pl.program_id(2)

    @pl.when(ki == 0)
    def _init():
        m_sc[...] = jnp.full_like(m_sc, -jnp.inf)
        l_sc[...] = jnp.zeros_like(l_sc)
        acc_sc[...] = jnp.zeros_like(acc_sc)

    q = q_ref[0, 0]                                               # (tq, dh) bf16, pre-scaled
    k = k_ref[0, 0]                                               # (tk, dh) bf16
    v = v_ref[0, 0]                                               # (tk, dh) bf16

    # Scores (tq, tk): contract d_head of q with d_head of k (no transpose).
    s = lax.dot_general(q, k, (((1,), (1,)), ((), ())),
                        preferred_element_type=jnp.float32)

    m_prev = m_sc[...]                                            # (tq, 1)
    m_new = jnp.maximum(m_prev, jnp.max(s, axis=-1, keepdims=True))
    alpha = jnp.exp(m_prev - m_new)
    p = jnp.exp(s - m_new)                                        # (tq, tk) f32
    l_sc[...] = alpha * l_sc[...] + jnp.sum(p, axis=-1, keepdims=True)
    acc_sc[...] = alpha * acc_sc[...] + lax.dot_general(
        p.astype(jnp.bfloat16), v, (((1,), (0,)), ((), ())),
        preferred_element_type=jnp.float32)
    m_sc[...] = m_new

    @pl.when(ki == pl.num_programs(2) - 1)
    def _finalize():
        inv_l = pl.reciprocal(l_sc[...], approx=True)             # (tq, 1)
        o_ref[0, 0] = (acc_sc[...] * inv_l).astype(o_ref.dtype)


def _out_proj_kernel(a_ref, w_ref, o_ref, *, d_model):
    """Merge heads + output projection: (h, tq, dh) -> (tq, D), then @ Wo.T."""
    tq = a_ref.shape[2]
    # Head merge relayout once per output tile (f32 relayout is the proven path).
    x = jnp.transpose(a_ref[0].astype(jnp.float32), (1, 0, 2)).reshape(tq, d_model)
    o = lax.dot_general(x.astype(jnp.bfloat16), w_ref[...], _DN_WT,
                        preferred_element_type=jnp.float32)
    o_ref[0] = o.astype(o_ref.dtype)


def _pick_tile(s, target):
    """Largest multiple of 8 that divides s and is <= target; else the full dim
    (keeps BlockSpecs (8,128)-legal and output stores sublane-dense)."""
    if s <= target:
        return s
    t = (target // 8) * 8
    while t >= 8:
        if s % t == 0:
            return t
        t -= 8
    return s   # no (8,*)-friendly divisor: fall back to the untiled full dim


def mha_forward(q, k, v, wq, wk, wv, wo, *, n_head,
                block_q=256, block_k=512, block_proj=256,
                vmem_limit_bytes=None):
    """q,k,v: [batch, seq, d_model]; weights: [d_model, d_model] ([out, in]).

    Tuning notes (per generation):
      * v6e: plenty of VMEM (128 MiB) — sweep block_k up to 1024 and raise
        vmem_limit_bytes if the compiler complains.
      * v7x: 64 MiB VMEM — the defaults fit comfortably since every kernel
        holds at most one weight and the flash score tile is only (tq, tk) f32.
      * v5e: defaults are fine; larger tk amortizes per-grid-step overhead.
    """
    batch, sq, d_model = q.shape
    sk = k.shape[1]
    assert v.shape[1] == sk, "k/v sequence lengths must match"
    assert k.shape[-1] == d_model and v.shape[-1] == d_model, "dim not match"
    assert d_model % n_head == 0
    d_head = d_model // n_head
    scale = float(d_head) ** (-0.5)
    out_dtype = q.dtype
    bf = jnp.bfloat16

    # bf16 MXU operands everywhere; accumulation stays f32 inside the kernels.
    q, k, v = q.astype(bf), k.astype(bf), v.astype(bf)
    wq, wk, wv, wo = (w.astype(bf) for w in (wq, wk, wv, wo))

    tq = _pick_tile(sq, block_q)
    tk = _pick_tile(sk, block_k)
    tpq = _pick_tile(sq, block_proj)
    tpk = _pick_tile(sk, block_proj)

    def cparams(sem):
        return pltpu.CompilerParams(dimension_semantics=sem,
                                    vmem_limit_bytes=vmem_limit_bytes)

    # ---------------- Stage 1: hoisted Q/K/V projections (head-major bf16) ----
    def project(x, w, seq, ts, scl):
        kern = functools.partial(_proj_kernel, n_head=n_head, d_head=d_head,
                                 scale=scl)
        return pl.pallas_call(
            kern,
            out_shape=jax.ShapeDtypeStruct((batch, n_head, seq, d_head), bf),
            grid_spec=pltpu.PrefetchScalarGridSpec(
                num_scalar_prefetch=0,
                grid=(batch, seq // ts),
                in_specs=[
                    pl.BlockSpec((1, ts, d_model), lambda b, i: (b, i, 0)),
                    # Constant-index weight: DMA'd once, stays resident. Only
                    # ONE weight per kernel now, so even double-buffering is
                    # 4*D^2 bytes — fits every generation's scoped VMEM.
                    pl.BlockSpec((d_model, d_model), lambda b, i: (0, 0)),
                ],
                out_specs=pl.BlockSpec((1, n_head, ts, d_head),
                                       lambda b, i: (b, 0, i, 0)),
            ),
            compiler_params=cparams(("parallel", "parallel")),
        )(x, w)

    qh = project(q, wq, sq, tpq, scale)   # pre-scaled Q
    kh = project(k, wk, sk, tpk, 1.0)
    vh = project(v, wv, sk, tpk, 1.0)

    # ---------------- Stage 2: flash attention, heads folded into the grid ----
    nh = n_head
    attn = pl.pallas_call(
        _flash_kernel,
        out_shape=jax.ShapeDtypeStruct((batch, n_head, sq, d_head), bf),
        grid_spec=pltpu.PrefetchScalarGridSpec(
            num_scalar_prefetch=0,
            grid=(batch * n_head, sq // tq, sk // tk),
            in_specs=[
                pl.BlockSpec((1, 1, tq, d_head),
                             lambda bh, qi, ki: (bh // nh, bh % nh, qi, 0)),
                pl.BlockSpec((1, 1, tk, d_head),
                             lambda bh, qi, ki: (bh // nh, bh % nh, ki, 0)),
                pl.BlockSpec((1, 1, tk, d_head),
                             lambda bh, qi, ki: (bh // nh, bh % nh, ki, 0)),
            ],
            out_specs=pl.BlockSpec((1, 1, tq, d_head),
                                   lambda bh, qi, ki: (bh // nh, bh % nh, qi, 0)),
            scratch_shapes=[
                pltpu.VMEM((tq, 1), jnp.float32),        # m (running max)
                pltpu.VMEM((tq, 1), jnp.float32),        # l (running sum)
                pltpu.VMEM((tq, d_head), jnp.float32),   # acc
            ],
        ),
        compiler_params=cparams(("parallel", "parallel", "arbitrary")),
    )(qh, kh, vh)

    # ---------------- Stage 3: head merge + output projection -----------------
    out = pl.pallas_call(
        functools.partial(_out_proj_kernel, d_model=d_model),
        out_shape=jax.ShapeDtypeStruct((batch, sq, d_model), out_dtype),
        grid_spec=pltpu.PrefetchScalarGridSpec(
            num_scalar_prefetch=0,
            grid=(batch, sq // tpq),
            in_specs=[
                pl.BlockSpec((1, n_head, tpq, d_head), lambda b, i: (b, 0, i, 0)),
                pl.BlockSpec((d_model, d_model), lambda b, i: (0, 0)),
            ],
            out_specs=pl.BlockSpec((1, tpq, d_model), lambda b, i: (b, i, 0)),
        ),
        compiler_params=cparams(("parallel", "parallel")),
    )(attn, wo)

    return out


def mha_reference(q, k, v, wq, wk, wv, wo, *, n_head):
    batch, sq, d_model = q.shape
    d_head = d_model // n_head
    scale = float(d_head) ** (-0.5)

    def split(x):
        b, s, _ = x.shape
        return jnp.transpose(x.reshape(b, s, n_head, d_head), (0, 2, 1, 3))

    Q, K, V = split(q @ wq.T), split(k @ wk.T), split(v @ wv.T)
    s = jnp.einsum('bhqd,bhkd->bhqk', Q * scale, K)
    attn = jax.nn.softmax(s, axis=-1)
    out = jnp.einsum('bhqk,bhkd->bhqd', attn, V)
    out = jnp.transpose(out, (0, 2, 1, 3)).reshape(batch, sq, d_model)
    return out @ wo.T


if __name__ == "__main__":
    batch, seq, d_model, n_head = 2, 16, 32, 4

    key = jax.random.PRNGKey(0)
    kq, kk, kv, k1, k2, k3, k4 = jax.random.split(key, 7)

    q = jax.random.normal(kq, (batch, seq, d_model), dtype=jnp.float32)
    k = jax.random.normal(kk, (batch, seq, d_model), dtype=jnp.float32)
    v = jax.random.normal(kv, (batch, seq, d_model), dtype=jnp.float32)

    # Deterministic Linear weights, shape [out_features, in_features]
    wscale = 1.0 / (d_model ** 0.5)
    wq = jax.random.uniform(k1, (d_model, d_model), jnp.float32, -wscale, wscale)
    wk = jax.random.uniform(k2, (d_model, d_model), jnp.float32, -wscale, wscale)
    wv = jax.random.uniform(k3, (d_model, d_model), jnp.float32, -wscale, wscale)
    wo = jax.random.uniform(k4, (d_model, d_model), jnp.float32, -wscale, wscale)

    # Small blocks so every grid has multiple tiles and the online-softmax
    # init / update / finalize paths are actually exercised.
    out = mha_forward(q, k, v, wq, wk, wv, wo, n_head=n_head,
                      block_q=8, block_k=8, block_proj=8)
    out = jax.block_until_ready(out)

    ref = mha_reference(q, k, v, wq, wk, wv, wo, n_head=n_head)
    assert out.shape == (batch, seq, d_model)
    # bf16 MXU operands vs. the f32 reference -> relaxed tolerance.
    assert jnp.allclose(out, ref, atol=5e-2, rtol=5e-2), "mismatch vs reference"

    print("KERNEL_OK")
</pallas_src>

<mosaic_0001>
module attributes {stable_mosaic.version = 11 : i64} {
  func.func @_proj_kernel(%arg0: i32, %arg1: i32, %arg2: memref<1x8x32xbf16, #tpu.memory_space<vmem>>, %arg3: memref<32x32xbf16, #tpu.memory_space<vmem>>, %arg4: memref<1x4x8x8xbf16, #tpu.memory_space<vmem>>) attributes {dimension_semantics = [#tpu.dimension_semantics<parallel>, #tpu.dimension_semantics<parallel>], iteration_bounds = array<i64: 2, 2>, scalar_prefetch = 0 : i64, scratch_operands = 0 : i64, tpu.core_type = #tpu.core_type<tc>, window_params = [{transform_indices = @transform_0, window_bounds = array<i64: 1, 8, 32>}, {pipeline_mode = #tpu.pipeline_mode<synchronous>, transform_indices = @transform_1, window_bounds = array<i64: 32, 32>}, {transform_indices = @transform_2, window_bounds = array<i64: 1, 4, 8, 8>}]} {
    %c0 = arith.constant 0 : index
    %c0_0 = arith.constant 0 : index
    %c0_1 = arith.constant 0 : index
    %0 = vector.load %arg2[%c0, %c0_0, %c0_1] : memref<1x8x32xbf16, #tpu.memory_space<vmem>>, vector<1x8x32xbf16>
    %1 = vector.shape_cast %0 : vector<1x8x32xbf16> to vector<8x32xbf16>
    %c0_2 = arith.constant 0 : index
    %c0_3 = arith.constant 0 : index
    %2 = vector.load %arg3[%c0_2, %c0_3] : memref<32x32xbf16, #tpu.memory_space<vmem>>, vector<32x32xbf16>
    %cst = arith.constant dense<0.000000e+00> : vector<8x32xf32>
    %3 = tpu.matmul %1, %2, %cst {dimension_numbers = #tpu.dot_dimension_numbers<[1], [1], [0], [0], [0, 0, 1, 0], [], []>} : vector<8x32xbf16>, vector<32x32xbf16>, vector<8x32xf32> -> vector<8x32xf32>
    %cst_4 = arith.constant 0.353553385 : f32
    %4 = vector.broadcast %cst_4 : f32 to vector<8x32xf32>
    %5 = arith.mulf %3, %4 : vector<8x32xf32>
    %6 = vector.shape_cast %5 : vector<8x32xf32> to vector<8x4x8xf32>
    %7 = tpu.transpose %6, [1, 0, 2] : vector<8x4x8xf32> -> vector<4x8x8xf32>
    %8 = arith.truncf %7 : vector<4x8x8xf32> to vector<4x8x8xbf16>
    %c0_5 = arith.constant 0 : index
    %c0_6 = arith.constant 0 : index
    %c0_7 = arith.constant 0 : index
    %c0_8 = arith.constant 0 : index
    %9 = vector.load %arg4[%c0_5, %c0_6, %c0_7, %c0_8] : memref<1x4x8x8xbf16, #tpu.memory_space<vmem>>, vector<1x4x8x8xbf16>
    %10 = vector.shape_cast %9 : vector<1x4x8x8xbf16> to vector<4x8x8xbf16>
    %11 = vector.shape_cast %8 : vector<4x8x8xbf16> to vector<1x4x8x8xbf16>
    tpu.vector_store %arg4[%c0_5, %c0_6, %c0_7, %c0_8], %11 {strides = array<i32>} : memref<1x4x8x8xbf16, #tpu.memory_space<vmem>>, vector<1x4x8x8xbf16>,
    return
  }
  func.func @transform_0(%arg0: i32, %arg1: i32) -> (i32, i32, i32) {
    %c0_i32 = arith.constant 0 : i32
    %c0_i32_0 = arith.constant 0 : i32
    return %arg0, %arg1, %c0_i32 : i32, i32, i32
  }
  func.func @transform_1(%arg0: i32, %arg1: i32) -> (i32, i32) {
    %c0_i32 = arith.constant 0 : i32
    %c0_i32_0 = arith.constant 0 : i32
    %c0_i32_1 = arith.constant 0 : i32
    return %c0_i32, %c0_i32_0 : i32, i32
  }
  func.func @transform_2(%arg0: i32, %arg1: i32) -> (i32, i32, i32, i32) {
    %c0_i32 = arith.constant 0 : i32
    %c0_i32_0 = arith.constant 0 : i32
    %c0_i32_1 = arith.constant 0 : i32
    return %arg0, %c0_i32, %arg1, %c0_i32_0 : i32, i32, i32, i32
  }
}

</mosaic_0001>

<bundles_post_ra>
// kernel: tpu_custom_call.1
= control target key start
LH: loop header
LB: loop body
LE: loop exit
PB: predicated region body
PF: predicated region fallthrough
CT: control target
= control target key end

     0   :  { %s1042_s0 = inlined_call_operand.hbm [shape: bf16[2,16,32], index: 0, kind: input, shape index: {}]   ;;  %s1043_s1 = inlined_call_operand.hbm [shape: bf16[32,32], index: 1, kind: input, shape index: {}]   ;;  %s1044_s2 = inlined_call_operand.vmem [shape: bf16[2,4,16,8], index: 2, kind: output, shape index: {}]  }
   0x1   :  { %1049 = sst [smem:[#allocation9_spill]] %s1043_s1 }
   0x2   :  { %7 = vsyncpa [#allocation3], 0 }
   0x3   :  { %9 = vsyncpa [#allocation3 + $0x1], 0 }
   0x4   :  { %10 = vsyncpa [#allocation5], 0  ;;  %s841_s9 = smov 0   ;;  %s843_s10 = smov 0  }
   0x5   :  { %s845_s11 = smov 0   ;;  %s847_s12 = smov 0  }
   0x6   :  { %s849_s13 = smov 0   ;;  %s851_s14 = smov 0  }
   0x7   :  { %s853_s15 = smov 0   ;;  %s855_s16 = smov 0  }
   0x8 LB: > { %s559_s17 = sadd.s32 4294967295, %s813_s16   ;;  %p50_p0 = scmp.ne.s32.totalorder %s789_s10, %s785_s9  ;;  %s813_s16 = sphi %s855_s16, %s16_s16   ;;  %s809_s15 = sphi %s853_s15, %s1068_s15   ;;  %s805_s14 = sphi %s851_s14, %s1067_s14   ;;  %s801_s13 = sphi %s849_s13, %s1066_s13   ;;  %s797_s12 = sphi %s847_s12, %s1065_s12   ;;  %s793_s11 = sphi %s845_s11, %s1064_s11   ;;  %s789_s10 = sphi %s843_s10, %s1063_s10   ;;  %s785_s9 = sphi %s841_s9, %s1062_s9  }
   0x9   : > { %p883_p1 = scmp.eq.s32.totalorder %s559_s17, 0  ;;  %p561_p2 = scmp.ge.s32.totalorder %s813_s16, 1 }
   0xa   : > { %p110_p3 = scmp.lt.s32.totalorder %s813_s16, 5  ;;  %s815_s21 = smov [#allocation4]  }
   0xb   : > { %s1050_s18 = scalar_select %p883_p1, 1, 0 }
   0xc   : > { %p891_p4 = por %p883_p1, %p50_p0  ;;  %p895_p5 = pnand %p561_p2, %p110_p3 }
   0xd   : > { %s122_s22 = sshll.u32 %s815_s21, 4  ;;  %s1054_s1 = sld [smem:[#allocation9_spill]]  ;;  %s123_s22 = int_to_ptr.vmem [resolvable:$true] %s122_s22 }
   0xe   : > { %s1051_s19 = scalar_select %p891_p4, 1, 0 }
   0xf   : > { %s1052_s20 = scalar_select %p895_p5, 1, 0 }
  0x10   : > { %p598_p6 = pneg %p895_p5 }
  0x12   : > { %p903_p7 = pnand %p598_p6, %p883_p1 }
  0x13   : > { %s685_s26 = scalar_lea.hbm %s1054_s1, 256 }
  0x14   : > { %p686_p8 = scmp.ne.s32.totalorder %s1054_s1, %s685_s26  ;;  %p687_p9 = pneg %p903_p7 }
  0x15   : > { %p692_p12 = scmp.lt.u32.totalorder %s685_s26, %s1054_s1 }
  0x16   : > { %p688_p10 = pnand %p687_p9, %p686_p8 }
  0x18   : > { %p689_p11 = pneg %p688_p10 }
  0x1a   : > { %p694_p13 = pnand %p692_p12, %p689_p11 }
  0x1c   : > { %697 = shalt.err (!%p694_p13)
}
  0x1d   : > { %s698_s3 = scalar_lea.vmem %s123_s22, 256  ;;  %p706_p6 = scmp.lt.s32.totalorder %s123_s22, %s123_s22 }
  0x1e   : > { %p699_p0 = scmp.ne.s32.totalorder %s123_s22, %s698_s3  ;;  %p707_p1 = scmp.lt.s32.totalorder %s698_s3, %s698_s3 }
  0x20   : > { %p701_p2 = pnand %p699_p0, %p687_p9  ;;  %p708_p4 = por %p707_p1, %p706_p6 }
  0x22   : > { %p702_p3 = pneg %p701_p2 }
  0x24   : > { %p709_p5 = pnand %p708_p4, %p702_p3 }
  0x26   : > { %712 = shalt.err (!%p709_p5)
}
  0x27   : > { %s816_s4 = smov 64   ;;  %s817_s5 = smov 4  }
  0x28   : > { %601 = dma.hbm_to_vmem [thread:$0]  (!%p903_p7), %s1054_s1, 256, %s123_s22, [#allocation5], %s816_s4, %s816_s4, %s817_s5  }
  0x29   : > { %p97_p1 = scmp.eq.s32.totalorder %s559_s17, 3  ;;  %s25_s8 = sadd.s32 1, %s805_s14 }
  0x2a   : > { %p26_p4 = scmp.ge.s32.totalorder %s25_s8, 2  ;;  %s28_s9 = sadd.s32 1, %s809_s15 }
  0x2b   : > { %p44_p5 = scmp.ne.s32.totalorder %s793_s11, %s789_s10  ;;  %p45_p8 = scmp.eq.s32.totalorder %s813_s16, 0 }
  0x2c   : > { %s1070_s8 = smov (%p26_p4, %s25_s8), 0  ;;  %s1072_s9 = smov (!%p26_p4, %s28_s9), %s809_s15 }
  0x2d   : > { %s33_s21 = ssub.s32 %s805_s14, %s1070_s8  ;;  %s37_s23 = sadd.s32 1, %s793_s11 }
  0x2e   : > { %p30_p9 = scmp.ge.s32.totalorder %s1072_s9, 2  ;;  %p936_p7 = por %p97_p1, %p44_p5 }
  0x2f   : > { %p940_p10 = por %p45_p8, %p44_p5  ;;  %s136_s24 = sand.u32 1, %s793_s11  }
  0x30   : > { %s1074_s9 = smov (%p30_p9, %s1072_s9), 0  ;;  %p607_p11 = scmp.lt.s32.totalorder %s813_s16, 4 }
  0x31   : > { %s564_s25 = sshll.u32 %s136_s24, 2  ;;  %s32_s26 = ssub.s32 %s809_s15, %s1074_s9 }
  0x32   : > { %s34_s27 = sor.u32 %s33_s21, %s32_s26  ;;  %s565_s28 = sshll.u32 %s809_s15, 1 }
  0x33   : > { %p35_p12 = scmp.eq.s32.totalorder %s34_s27, 0  ;;  %s145_s29 = sadd.s32 %s805_s14, %s565_s28 }
  0x34   : > { %s566_s30 = sshll.u32 %s145_s29, 6  ;;  %s140_s3 = scalar_lea.vmem [#allocation2], %s564_s25 }
  0x35   : > { %s149_s4 = sshll.u32 %s140_s3, 4  ;;  %s958_s1 = scalar_lea.hbm %s1042_s0, %s566_s30  ;;  %s960_s4 = int_to_ptr.vmem [resolvable:$true] %s149_s4 }
  0x36   : > { %s953_s5 = scalar_select %p35_p12, %s793_s11, %s37_s23  }
  0x37   : > { %p966_p13 = pnand %p607_p11, %p940_p10  ;;  %s137_s23 = scalar_lea.sflag [#allocation3], %s136_s24 }
  0x38   : > { %s713_s25 = scalar_lea.hbm %s958_s1, 64  ;;  %s718_s17 = scalar_lea.hbm %s1042_s0, 256 }
  0x39   : > { %p714_p0 = scmp.ne.s32.totalorder %s958_s1, %s713_s25  ;;  %p715_p2 = pneg %p966_p13 }
  0x3a   : > { %p719_p1 = scmp.lt.u32.totalorder %s958_s1, %s1042_s0  ;;  %p720_p4 = scmp.lt.u32.totalorder %s718_s17, %s713_s25 }
  0x3b   : > { %p716_p3 = pnand %p715_p2, %p714_p0  ;;  %p722_p8 = scmp.lt.u32.totalorder %s713_s25, %s958_s1 }
  0x3c   : > { %p721_p5 = por %p720_p4, %p719_p1 }
  0x3d   : > { %p717_p6 = pneg %p716_p3 }
  0x3e   : > { %p723_p9 = por %p722_p8, %p721_p5 }
  0x40   : > { %p724_p10 = pnand %p723_p9, %p717_p6 }
  0x42   : > { %727 = shalt.err (!%p724_p10)
}
  0x43   : > { %s728_s24 = scalar_lea.vmem %s960_s4, 64  ;;  %s818_s30 = smov [#allocation2]  }
  0x44   : > { %p729_p11 = scmp.ne.s32.totalorder %s960_s4, %s728_s24  ;;  %s733_s3 = sshll.u32 %s818_s30, 4  ;;  %s734_s3 = int_to_ptr.vmem [resolvable:$false] %s733_s3 }
  0x45   : > { %s735_s6 = scalar_lea.vmem %s734_s3, 128  ;;  %p736_p3 = scmp.lt.s32.totalorder %s960_s4, %s734_s3 }
  0x46   : > { %p731_p12 = pnand %p729_p11, %p715_p2  ;;  %p737_p1 = scmp.lt.s32.totalorder %s735_s6, %s728_s24 }
  0x48   : > { %p732_p0 = pneg %p731_p12  ;;  %p738_p4 = por %p737_p1, %p736_p3 }
  0x4a   : > { %p739_p5 = pnand %p738_p4, %p732_p0 }
  0x4c   : > { %742 = shalt.err (!%p739_p5)
}
  0x4d   : > { %605 = dma.hbm_to_vmem [thread:$0]  (!%p966_p13), %s958_s1, 64, %s960_s4, %s137_s23  }
  0x4e   : > { %p1058_p6 = scmp.ne.s32.totalorder %s1052_s20, 0 }
  0x4f   : > { %s998_s7 = sand.u32 (!%p1058_p6), 1, %s789_s10   ;;  %p1059_p2 = scmp.ne.s32.totalorder (!%p1058_p6), %s1051_s19, 0 }
  0x50   : > { %158 = sbr.rel (%p1058_p6) target bundleno = 472 (0x1d8), region = 28  ;;  %s568_s25 = sshll.u32 (!%p1058_p6), %s998_s7, 2 }
  0x51   : > { %s161_s26 = scalar_lea.sflag (!%p1058_p6), [#allocation3], %s998_s7  ;;  %s164_s27 = scalar_lea.vmem (!%p1058_p6), [#allocation2], %s568_s25 }
  0x57   : > { %776 = dma.done.wait (%p1059_p2), %s161_s26, 64  }
  0x58   : > { %778 = vsyncadd (%p1059_p2), %s161_s26, 4294967232  ;;  %p1060_p8 = scmp.ne.s32.totalorder %s1050_s18, 0 }
  0x5a   : > { %780 = dma.done.wait (%p1060_p8), [#allocation5], 256  }
  0x5b   : > { %782 = vsyncadd (%p1060_p8), [#allocation5], 4294967040  ;;  %v819_v0 = vmov 0.0   ;;  %vm820_vm0 = vmmov 0   ;;  %vm204_vm1 = vcmask 261120   ;;  %v683_v1 = vld [vmem:[#allocation4] sm:$0xff]   ;;  %v270_v13 = vlaneseq }
  0x5c   : > { %584 = vmatprep.subr.bf16.mxu0 %v819_v0  ;;  %588 = vmatprep.mubr.msk.bf16.mxu0 %vm820_vm0, %v819_v0  ;;  %v209_v2 = vsel %vm204_vm1, %v683_v1, 0  ;;  %v684_v3 = vld [vmem:[#allocation4 + $0x8] sm:$0xff]   ;;  %v189_v5 = vld [vmem:[%s164_s27] sm:$0xf]  ;;  %s821_s1 = smov 104   ;;  %s822_s18 = smov 120  }
  0x5d   : > { %585 = vmatpush3.bf16.xpose.msra.mxu0 %v209_v2  ;;  %v212_v4 = vsel %vm204_vm1, %v684_v3, 0  ;;  %s823_s19 = smov 112   ;;  %v824_v11 = vmov 1983009808   ;;  %v825_v14 = vmov 1934713408  }
  0x5e   : > { %586 = vmatprep.subr.bf16.mxu0 %v819_v0  ;;  %v268_v12 = vunpack.c.l.s4 %v824_v11  ;;  %v300_v15 = vunpack.c.l.s4 %v825_v14  ;;  %v271_v17 = vshrl.u32 %v270_v13, 7  ;;  %s570_s20 = sshll.u32 %s998_s7, 4  ;;  %vm405_vm2 = vcmask 60416   ;;  %s577_s21 = sshll.u32 (%p936_p7), %s801_s13, 3 }
  0x5f   : > { %s187_s4 = scalar_lea.vmem [#allocation6], %s570_s20  ;;  %s418_s23 = sadd.s32 (%p936_p7), %s797_s12, %s577_s21 }
  0x60   : > { %v269_v16 = vunpack.c.0.s8 %v268_v12  ;;  %v301_v20 = vunpack.c.0.s8 %v300_v15  ;;  %s578_s17 = sshll.u32 (%p936_p7), %s418_s23, 2 }
  0x61   : > { %s420_s24 = scalar_lea.vmem (%p936_p7), %s1044_s2, %s578_s17 }
  0x62   : > { %v272_v21 = vsub.s32 %v269_v16, %v271_v17  ;;  %v304_v27 = vsub.s32 %v301_v20, %v271_v17 }
  0x65   : > { %587 = vmatpush3.bf16.xpose.msra.mxu0 %v212_v4 }
  0x6c   : > { %589 = vmatmul.mubr.msk.bf16.vlgmr.msra.gmra.mrb[0].mxu0 %vm204_vm1, %v189_v5 }
 0x13f   : > { %v248_v6 = vpop.f32.mrb[0].mxu0 }
 0x140   : > { %v254_v7 = vmul.f32 0.35355338, %v248_v6  ;;  %v590_v8 = vpop.f32.mrb[1].mxu0 }
 0x141   : > { %v251_v9 = vpop.f32.mrb[2].mxu0 }
 0x142   : > { %262 = vrot.lane.b32.xlu1 %v254_v7, %s821_s1  ;;  %256 = vrot.lane.b32.xlu0 %v254_v7, %s822_s18  ;;  %v591_v10 = vpop.f32.mrb[3].mxu0 }
 0x146   : > { %259 = vrot.lane.b32.xlu0 %v254_v7, %s823_s19 }
 0x1b4   : > { %v263_v18 = vpop.permute.xlu1 %262  ;;  %v257_v19 = vpop.permute.xlu0 %256 }
 0x1b5   : > { %v281_v22 = vcombine.low %v257_v19, %v263_v18  ;;  %v282_v23 = vcombine.high %v257_v19, %v263_v18 }
 0x1b7   : > { %v289_v28 = vrot.slane %v281_v22, %v272_v21  ;;  %v296_v29 = vrot.slane %v282_v23, %v272_v21 }
 0x1b8   : > { %v260_v24 = vpop.permute.xlu0 %259 }
 0x1b9   : > { %v265_v25 = vcombine.low %v254_v7, %v260_v24  ;;  %v266_v26 = vcombine.high %v254_v7, %v260_v24 }
 0x1bb   : > { %v273_v30 = vrot.slane %v265_v25, %v272_v21  ;;  %v280_v31 = vrot.slane %v266_v26, %v272_v21 }
 0x1bd   : > { %v297_v32 = vcombine.low %v273_v30, %v289_v28  ;;  %v298_v33 = vcombine.high %v273_v30, %v289_v28  ;;  %v313_v34 = vcombine.low %v280_v31, %v296_v29  ;;  %v314_v35 = vcombine.high %v280_v31, %v296_v29 }
 0x1bf   : > { %v305_v36 = vrot.slane %v297_v32, %v304_v27  ;;  %v312_v37 = vrot.slane %v298_v33, %v304_v27  ;;  %v321_v38 = vrot.slane %v313_v34, %v304_v27  ;;  %v328_v39 = vrot.slane %v314_v35, %v304_v27 }
 0x1c1   : > { %v333_v40 = vcombine.low %v305_v36, %v312_v37  ;;  %v574_v41 = vcombine.high %v305_v36, %v312_v37  ;;  %v349_v42 = vcombine.low %v321_v38, %v328_v39  ;;  %v575_v43 = vcombine.high %v321_v38, %v328_v39 }
 0x1c3   : > { %v340_v44 = vrot.slane %v333_v40, %v272_v21  ;;  %v348_v45 = vrot.slane %v574_v41, %v272_v21  ;;  %v356_v46 = vrot.slane %v349_v42, %v272_v21  ;;  %v364_v47 = vrot.slane %v575_v43, %v272_v21 }
 0x1c5   : > { %v365_v48 = vcombine.low %v340_v44, %v348_v45  ;;  %v366_v49 = vcombine.high %v340_v44, %v348_v45  ;;  %v381_v50 = vcombine.low %v356_v46, %v364_v47  ;;  %v382_v51 = vcombine.high %v356_v46, %v364_v47 }
 0x1c7   : > { %v373_v52 = vrot.slane %v365_v48, %v304_v27  ;;  %v380_v53 = vrot.slane %v366_v49, %v304_v27  ;;  %v389_v54 = vrot.slane %v381_v50, %v304_v27  ;;  %v396_v55 = vrot.slane %v382_v51, %v304_v27 }
 0x1c8   : > { %416 = sbr.rel (!%p936_p7) target bundleno = 472 (0x1d8), region = 40 }
 0x1c9   : > { %v397_v56 = vcombine.low %v373_v52, %v389_v54  ;;  %v398_v57 = vcombine.high %v373_v52, %v389_v54  ;;  %v399_v58 = vcombine.low %v380_v53, %v396_v55  ;;  %v400_v59 = vcombine.high %v380_v53, %v396_v55 }
 0x1cb   : > { %v401_v60 = vpack.c.bf16 %v397_v56, %v397_v56  ;;  %v402_v61 = vpack.c.bf16 %v398_v57, %v398_v57  ;;  %v403_v62 = vpack.c.bf16 %v399_v58, %v399_v58  ;;  %v404_v63 = vpack.c.bf16 %v400_v59, %v400_v59 }
 0x1cd   : > { %406 = vst.msk [vmem:[%s187_s4] sm:$0xf] %vm405_vm2, %v401_v60  ;;  %407 = vst.msk [vmem:[%s187_s4 + $0x4] sm:$0xf] %vm405_vm2, %v402_v61 }
 0x1ce   : > { %408 = vst.msk [vmem:[%s187_s4 + $0x8] sm:$0xf] %vm405_vm2, %v403_v62  ;;  %409 = vst.msk [vmem:[%s187_s4 + $0xc] sm:$0xf] %vm405_vm2, %v404_v63 }
 0x1d4   : > { %v436_v0 = vld [vmem:[%s187_s4] sm:$0xf]  ;;  %v438_v1 = vld [vmem:[%s187_s4 + $0x4] sm:$0xf] }
 0x1d5   : > { %v440_v2 = vld [vmem:[%s187_s4 + $0x8] sm:$0xf]  ;;  %v442_v3 = vld [vmem:[%s187_s4 + $0xc] sm:$0xf]  ;;  %437 = vst [vmem:[%s420_s24] sm:$0xf] %v436_v0 }
 0x1d6   : > { %439 = vst [vmem:[%s420_s24 + $0x8] sm:$0xf] %v438_v1  ;;  %441 = vst [vmem:[%s420_s24 + $0x10] sm:$0xf] %v440_v2 }
 0x1d7   : > { %443 = vst [vmem:[%s420_s24 + $0x18] sm:$0xf] %v442_v3 }
 0x1d8 PF: > { %s16_s16 = sadd.s32 1, %s813_s16   ;;  %s1061_s22 = smov %s1074_s9 }
 0x1d9   : > { %p13_p7 = scmp.ge.s32.totalorder %s16_s16, 6   ;;  %s1062_s9 = smov %s789_s10 }
 0x1da   : > { %s1063_s10 = smov %s793_s11  ;;  %s1064_s11 = smov %s953_s5 }
 0x1db   : > { %s1065_s12 = smov %s805_s14  ;;  %s1066_s13 = smov %s809_s15 }
 0x1dc   : > { %s1067_s14 = smov %s1070_s8  ;;  %s1068_s15 = smov %s1061_s22 }
 0x1dd   :  { %15 = sbr.rel (!%p13_p7) target bundleno = 8 (0x8), region = 113 }
 0x1e4   :  { %484 = vsyncpa [#allocation3], 1 }
 0x1e5   :  { %486 = vsyncpa [#allocation3 + $0x1], 1 }
 0x1e6   :  { %487 = vsyncpa [#allocation5], 1 }

</bundles_post_ra>
